<compile_context>
chip_gen: v7x
topology: tpu7x:2x2x1
jax: 0.10.0
libtpu: 0.0.40
codegen_flags: <defaults>
</compile_context>

<pallas_src>
from functools import partial

import jax
import jax.numpy as jnp
from jax.experimental import pallas as pl
from jax.experimental.pallas import tpu as pltpu


def _round_up(x, m):
    return (x + m - 1) // m * m


def _rnn_encoder_kernel(n_layers, spikes_ref, h_prev_ref, w_ih0_ref, w_sq_ref,
                        b_ref, w_head_ref, b_head_ref, head_ref, h_out_ref):
    """Single-timestep multi-layer RNN + fused [mu|logvar] head.

    All operands are full-array VMEM blocks; the layer loop is statically
    unrolled. h_prev_ref and h_out_ref alias the same HBM buffer: layer l reads
    only slot l before writing it, so the in-place update is safe.
    """
    L = n_layers
    cdt = w_sq_ref.dtype                            # bf16 compute dtype for the MXU

    # Layer 0: input is spikes.
    acc = jnp.dot(spikes_ref[...].astype(cdt), w_ih0_ref[...],
                  preferred_element_type=jnp.float32)
    acc += jnp.dot(h_prev_ref[0].astype(cdt), w_sq_ref[0],
                   preferred_element_type=jnp.float32)
    x = jnp.tanh(acc + b_ref[0])                    # (B, H) f32
    h_out_ref[0] = x.astype(h_out_ref.dtype)

    # Layers 1..L-1: input is previous layer output.
    for l in range(1, L):                           # static unroll
        acc = jnp.dot(x.astype(cdt), w_sq_ref[L + l - 1],     # W_ih_l^T
                      preferred_element_type=jnp.float32)
        acc += jnp.dot(h_prev_ref[l].astype(cdt), w_sq_ref[l],  # W_hh_l^T
                       preferred_element_type=jnp.float32)
        x = jnp.tanh(acc + b_ref[l])
        h_out_ref[l] = x.astype(h_out_ref.dtype)

    # Fused, lane-dense [mu | logvar | zero-pad] head: one dot, one store.
    head_ref[...] = (
        jnp.dot(x.astype(cdt), w_head_ref[...], preferred_element_type=jnp.float32)
        + b_head_ref[...]
    ).astype(head_ref.dtype)


def pack_params(params, compute_dtype=jnp.bfloat16):
    """Pack parameters into contiguous slabs. Call ONCE, not per timestep."""
    rnn = params["rnn"]
    L = len(rnn)
    H = rnn[0][1].shape[0]                                    # w_hh is (H, H)

    # Layer-0 input-hidden weight, transposed for x @ W.
    w_ih0 = rnn[0][0].T.astype(compute_dtype)                 # (n_inputs, H)
    # Square (H, H) weights: [W_hh_0..W_hh_{L-1}, W_ih_1..W_ih_{L-1}], transposed.
    sq = [w_hh.T for (_, w_hh, _, _) in rnn] + [rnn[l][0].T for l in range(1, L)]
    w_sq = jnp.stack(sq).astype(compute_dtype)                # (2L-1, H, H)
    # Pre-summed biases (b_ih + b_hh), kept f32.
    b_slab = jnp.stack([(b_ih + b_hh).reshape(1, H)
                        for (_, _, b_ih, b_hh) in rnn]).astype(jnp.float32)

    w_mu, b_mu = params["fc_mu"]
    w_var, b_var = params["fc_var"]
    latent = w_mu.shape[0]
    n_head = _round_up(2 * latent, 128)                       # lane-dense head
    w_head = jnp.zeros((H, n_head), jnp.float32)
    w_head = w_head.at[:, :latent].set(w_mu.T).at[:, latent:2 * latent].set(w_var.T)
    b_head = jnp.zeros((1, n_head), jnp.float32)
    b_head = b_head.at[0, :latent].set(b_mu).at[0, latent:2 * latent].set(b_var)

    return {"w_ih0": w_ih0, "w_sq": w_sq, "b": b_slab,
            "w_head": w_head.astype(compute_dtype), "b_head": b_head}


def rnn_encoder_apply(spikes, hidden_state, packed, *, latent_dim):
    """One RNNEncoder forward step. Returns (mu, logvar, new_hidden_state)."""
    n_layers, batch, hidden_dim = hidden_state.shape
    n_inputs = spikes.shape[-1]
    n_head = packed["w_head"].shape[-1]

    operands = (spikes, hidden_state, packed["w_ih0"], packed["w_sq"],
                packed["b"], packed["w_head"], packed["b_head"])

    vmem = pl.BlockSpec(memory_space=pltpu.MemorySpace.VMEM)
    out_shape = (
        jax.ShapeDtypeStruct((batch, n_head), jnp.float32),            # [mu|logvar]
        jax.ShapeDtypeStruct(hidden_state.shape, hidden_state.dtype),  # new hidden
    )

    flops = 2 * batch * (n_inputs * hidden_dim
                         + (2 * n_layers - 1) * hidden_dim * hidden_dim
                         + hidden_dim * n_head)
    bytes_accessed = int(sum(int(x.size) * x.dtype.itemsize for x in operands)
                         + batch * n_head * 4
                         + int(hidden_state.size) * hidden_state.dtype.itemsize)
    cost = pl.CostEstimate(flops=int(flops),
                           transcendentals=int(n_layers * batch * hidden_dim),
                           bytes_accessed=bytes_accessed)

    # Everything is VMEM-resident (no grid); give explicit headroom, capped below
    # v7x's 64 MiB physical VMEM (v5e default scoped limit is only 16 MiB).
    vmem_limit = int(min(max(2 * bytes_accessed, 1 << 20), 64 << 20))

    head, h_new = pl.pallas_call(
        partial(_rnn_encoder_kernel, n_layers),
        out_shape=out_shape,
        in_specs=[vmem] * len(operands),
        out_specs=(vmem, vmem),
        input_output_aliases={1: 1},        # hidden_state updated in place
        compiler_params=pltpu.CompilerParams(vmem_limit_bytes=vmem_limit),
        cost_estimate=cost,
    )(*operands)

    mu = head[:, :latent_dim]
    logvar = head[:, latent_dim:2 * latent_dim]
    return mu, logvar, h_new


# jit once; donate hidden_state so the in/out alias is a true zero-copy update.
rnn_encoder_step = jax.jit(rnn_encoder_apply, static_argnames=("latent_dim",),
                           donate_argnums=(1,))


def rnn_encoder_ref(spikes, hidden_state, params):
    """Pure-JAX f32 reference (mirrors torch.nn.RNN with tanh, seq_len=1)."""
    x = spikes.astype(jnp.float32)
    h_new = []
    for l, (w_ih, w_hh, b_ih, b_hh) in enumerate(params["rnn"]):
        h = jnp.tanh(x @ w_ih.T + b_ih + hidden_state[l] @ w_hh.T + b_hh)
        h_new.append(h)
        x = h
    w_mu, b_mu = params["fc_mu"]
    w_var, b_var = params["fc_var"]
    return x @ w_mu.T + b_mu, x @ w_var.T + b_var, jnp.stack(h_new)


def init_params(key, n_inputs, hidden_dim, n_layers, latent_dim):
    """Deterministic synthetic parameters matching torch.nn.RNN / nn.Linear shapes."""
    keys = jax.random.split(key, 4 * n_layers + 4)
    scale = 1.0 / jnp.sqrt(jnp.float32(hidden_dim))
    ki = 0
    rnn = []
    for l in range(n_layers):
        in_dim = n_inputs if l == 0 else hidden_dim
        w_ih = jax.random.uniform(keys[ki], (hidden_dim, in_dim), jnp.float32, -scale, scale); ki += 1
        w_hh = jax.random.uniform(keys[ki], (hidden_dim, hidden_dim), jnp.float32, -scale, scale); ki += 1
        b_ih = jax.random.uniform(keys[ki], (hidden_dim,), jnp.float32, -scale, scale); ki += 1
        b_hh = jax.random.uniform(keys[ki], (hidden_dim,), jnp.float32, -scale, scale); ki += 1
        rnn.append((w_ih, w_hh, b_ih, b_hh))
    w_mu = jax.random.uniform(keys[ki], (latent_dim, hidden_dim), jnp.float32, -scale, scale); ki += 1
    b_mu = jax.random.uniform(keys[ki], (latent_dim,), jnp.float32, -scale, scale); ki += 1
    w_var = jax.random.uniform(keys[ki], (latent_dim, hidden_dim), jnp.float32, -scale, scale); ki += 1
    b_var = jax.random.uniform(keys[ki], (latent_dim,), jnp.float32, -scale, scale)
    return {"rnn": rnn, "fc_mu": (w_mu, b_mu), "fc_var": (w_var, b_var)}


if __name__ == "__main__":
    batch, n_inputs, hidden_dim, n_layers, latent_dim = 2, 16, 32, 2, 8

    key = jax.random.PRNGKey(0)
    k_params, k_s1, k_s2 = jax.random.split(key, 3)
    params = init_params(k_params, n_inputs, hidden_dim, n_layers, latent_dim)

    # Pack the parameters ONCE (hoisted out of the per-timestep path).
    packed = pack_params(params)

    # "spikes": binary activity, shape [batch, n_inputs]
    spikes1 = (jax.random.uniform(k_s1, (batch, n_inputs)) < 0.3).astype(jnp.float32)
    spikes2 = (jax.random.uniform(k_s2, (batch, n_inputs)) < 0.3).astype(jnp.float32)
    # first call: hidden_state initialised to zeros (as in the PyTorch module)
    h0 = jnp.zeros((n_layers, batch, hidden_dim), jnp.float32)

    tol = dict(rtol=2e-2, atol=2e-2)   # bf16 weights, f32 accumulation

    # ---- step 1 (fresh zero hidden state; h0 is donated to the call) ----
    mu_ref1, lv_ref1, h_ref1 = rnn_encoder_ref(spikes1, h0, params)
    mu1, lv1, h1 = jax.block_until_ready(
        rnn_encoder_step(spikes1, h0, packed, latent_dim=latent_dim))
    assert jnp.allclose(mu1, mu_ref1, **tol)
    assert jnp.allclose(lv1, lv_ref1, **tol)
    assert jnp.allclose(h1, h_ref1, **tol)

    # ---- step 2 (recurrent state carried over; h1 donated into this call) ----
    mu_ref2, lv_ref2, h_ref2 = rnn_encoder_ref(spikes2, h1, params)
    mu2, lv2, h2 = jax.block_until_ready(
        rnn_encoder_step(spikes2, h1, packed, latent_dim=latent_dim))
    assert jnp.allclose(mu2, mu_ref2, **tol)
    assert jnp.allclose(lv2, lv_ref2, **tol)
    assert jnp.allclose(h2, h_ref2, **tol)

    print("KERNEL_OK")
</pallas_src>

<mosaic_0001>
module attributes {stable_mosaic.version = 11 : i64} {
  func.func @_rnn_encoder_kernel(%arg0: memref<2x16xf32, #tpu.memory_space<vmem>>, %arg1: memref<2x2x32xf32, #tpu.memory_space<vmem>>, %arg2: memref<16x32xbf16, #tpu.memory_space<vmem>>, %arg3: memref<3x32x32xbf16, #tpu.memory_space<vmem>>, %arg4: memref<2x1x32xf32, #tpu.memory_space<vmem>>, %arg5: memref<32x128xbf16, #tpu.memory_space<vmem>>, %arg6: memref<1x128xf32, #tpu.memory_space<vmem>>, %arg7: memref<2x128xf32, #tpu.memory_space<vmem>>, %arg8: memref<2x2x32xf32, #tpu.memory_space<vmem>>) attributes {dimension_semantics = [], scalar_prefetch = 0 : i64, scratch_operands = 0 : i64, tpu.core_type = #tpu.core_type<tc>} {
    %c0 = arith.constant 0 : index
    %c0_0 = arith.constant 0 : index
    %0 = vector.load %arg0[%c0, %c0_0] : memref<2x16xf32, #tpu.memory_space<vmem>>, vector<2x16xf32>
    %1 = arith.truncf %0 : vector<2x16xf32> to vector<2x16xbf16>
    %c0_1 = arith.constant 0 : index
    %c0_2 = arith.constant 0 : index
    %2 = vector.load %arg2[%c0_1, %c0_2] : memref<16x32xbf16, #tpu.memory_space<vmem>>, vector<16x32xbf16>
    %cst = arith.constant dense<0.000000e+00> : vector<2x32xf32>
    %3 = tpu.matmul %1, %2, %cst {dimension_numbers = #tpu.dot_dimension_numbers<[1], [0], [0], [1], [0, 0, 1, 1], [], []>} : vector<2x16xbf16>, vector<16x32xbf16>, vector<2x32xf32> -> vector<2x32xf32>
    %c0_3 = arith.constant 0 : index
    %c0_4 = arith.constant 0 : index
    %c0_5 = arith.constant 0 : index
    %4 = vector.load %arg1[%c0_3, %c0_4, %c0_5] : memref<2x2x32xf32, #tpu.memory_space<vmem>>, vector<1x2x32xf32>
    %5 = vector.shape_cast %4 : vector<1x2x32xf32> to vector<2x32xf32>
    %6 = arith.truncf %5 : vector<2x32xf32> to vector<2x32xbf16>
    %c0_6 = arith.constant 0 : index
    %c0_7 = arith.constant 0 : index
    %c0_8 = arith.constant 0 : index
    %7 = vector.load %arg3[%c0_6, %c0_7, %c0_8] : memref<3x32x32xbf16, #tpu.memory_space<vmem>>, vector<1x32x32xbf16>
    %8 = vector.shape_cast %7 : vector<1x32x32xbf16> to vector<32x32xbf16>
    %cst_9 = arith.constant dense<0.000000e+00> : vector<2x32xf32>
    %9 = tpu.matmul %6, %8, %cst_9 {dimension_numbers = #tpu.dot_dimension_numbers<[1], [0], [0], [1], [0, 0, 1, 1], [], []>} : vector<2x32xbf16>, vector<32x32xbf16>, vector<2x32xf32> -> vector<2x32xf32>
    %10 = arith.addf %3, %9 : vector<2x32xf32>
    %c0_10 = arith.constant 0 : index
    %c0_11 = arith.constant 0 : index
    %c0_12 = arith.constant 0 : index
    %11 = vector.load %arg4[%c0_10, %c0_11, %c0_12] : memref<2x1x32xf32, #tpu.memory_space<vmem>>, vector<1x1x32xf32>
    %12 = vector.shape_cast %11 : vector<1x1x32xf32> to vector<1x32xf32>
    %13 = vector.broadcast %12 : vector<1x32xf32> to vector<2x32xf32>
    %14 = arith.addf %10, %13 : vector<2x32xf32>
    %15 = math.tanh %14 : vector<2x32xf32>
    %c0_13 = arith.constant 0 : index
    %c0_14 = arith.constant 0 : index
    %c0_15 = arith.constant 0 : index
    %16 = vector.load %arg8[%c0_13, %c0_14, %c0_15] : memref<2x2x32xf32, #tpu.memory_space<vmem>>, vector<1x2x32xf32>
    %17 = vector.shape_cast %16 : vector<1x2x32xf32> to vector<2x32xf32>
    %18 = vector.shape_cast %15 : vector<2x32xf32> to vector<1x2x32xf32>
    tpu.vector_store %arg8[%c0_13, %c0_14, %c0_15], %18 {strides = array<i32>} : memref<2x2x32xf32, #tpu.memory_space<vmem>>, vector<1x2x32xf32>,
    %19 = arith.truncf %15 : vector<2x32xf32> to vector<2x32xbf16>
    %c2 = arith.constant 2 : index
    %c0_16 = arith.constant 0 : index
    %c0_17 = arith.constant 0 : index
    %20 = vector.load %arg3[%c2, %c0_16, %c0_17] : memref<3x32x32xbf16, #tpu.memory_space<vmem>>, vector<1x32x32xbf16>
    %21 = vector.shape_cast %20 : vector<1x32x32xbf16> to vector<32x32xbf16>
    %cst_18 = arith.constant dense<0.000000e+00> : vector<2x32xf32>
    %22 = tpu.matmul %19, %21, %cst_18 {dimension_numbers = #tpu.dot_dimension_numbers<[1], [0], [0], [1], [0, 0, 1, 1], [], []>} : vector<2x32xbf16>, vector<32x32xbf16>, vector<2x32xf32> -> vector<2x32xf32>
    %c1 = arith.constant 1 : index
    %c0_19 = arith.constant 0 : index
    %c0_20 = arith.constant 0 : index
    %23 = vector.load %arg1[%c1, %c0_19, %c0_20] : memref<2x2x32xf32, #tpu.memory_space<vmem>>, vector<1x2x32xf32>
    %24 = vector.shape_cast %23 : vector<1x2x32xf32> to vector<2x32xf32>
    %25 = arith.truncf %24 : vector<2x32xf32> to vector<2x32xbf16>
    %c1_21 = arith.constant 1 : index
    %c0_22 = arith.constant 0 : index
    %c0_23 = arith.constant 0 : index
    %26 = vector.load %arg3[%c1_21, %c0_22, %c0_23] : memref<3x32x32xbf16, #tpu.memory_space<vmem>>, vector<1x32x32xbf16>
    %27 = vector.shape_cast %26 : vector<1x32x32xbf16> to vector<32x32xbf16>
    %cst_24 = arith.constant dense<0.000000e+00> : vector<2x32xf32>
    %28 = tpu.matmul %25, %27, %cst_24 {dimension_numbers = #tpu.dot_dimension_numbers<[1], [0], [0], [1], [0, 0, 1, 1], [], []>} : vector<2x32xbf16>, vector<32x32xbf16>, vector<2x32xf32> -> vector<2x32xf32>
    %29 = arith.addf %22, %28 : vector<2x32xf32>
    %c1_25 = arith.constant 1 : index
    %c0_26 = arith.constant 0 : index
    %c0_27 = arith.constant 0 : index
    %30 = vector.load %arg4[%c1_25, %c0_26, %c0_27] : memref<2x1x32xf32, #tpu.memory_space<vmem>>, vector<1x1x32xf32>
    %31 = vector.shape_cast %30 : vector<1x1x32xf32> to vector<1x32xf32>
    %32 = vector.broadcast %31 : vector<1x32xf32> to vector<2x32xf32>
    %33 = arith.addf %29, %32 : vector<2x32xf32>
    %34 = math.tanh %33 : vector<2x32xf32>
    %c1_28 = arith.constant 1 : index
    %c0_29 = arith.constant 0 : index
    %c0_30 = arith.constant 0 : index
    %35 = vector.load %arg8[%c1_28, %c0_29, %c0_30] : memref<2x2x32xf32, #tpu.memory_space<vmem>>, vector<1x2x32xf32>
    %36 = vector.shape_cast %35 : vector<1x2x32xf32> to vector<2x32xf32>
    %37 = vector.shape_cast %34 : vector<2x32xf32> to vector<1x2x32xf32>
    tpu.vector_store %arg8[%c1_28, %c0_29, %c0_30], %37 {strides = array<i32>} : memref<2x2x32xf32, #tpu.memory_space<vmem>>, vector<1x2x32xf32>,
    %38 = arith.truncf %34 : vector<2x32xf32> to vector<2x32xbf16>
    %c0_31 = arith.constant 0 : index
    %c0_32 = arith.constant 0 : index
    %39 = vector.load %arg5[%c0_31, %c0_32] : memref<32x128xbf16, #tpu.memory_space<vmem>>, vector<32x128xbf16>
    %cst_33 = arith.constant dense<0.000000e+00> : vector<2x128xf32>
    %40 = tpu.matmul %38, %39, %cst_33 {dimension_numbers = #tpu.dot_dimension_numbers<[1], [0], [0], [1], [0, 0, 1, 1], [], []>} : vector<2x32xbf16>, vector<32x128xbf16>, vector<2x128xf32> -> vector<2x128xf32>
    %c0_34 = arith.constant 0 : index
    %c0_35 = arith.constant 0 : index
    %41 = vector.load %arg6[%c0_34, %c0_35] : memref<1x128xf32, #tpu.memory_space<vmem>>, vector<1x128xf32>
    %42 = vector.broadcast %41 : vector<1x128xf32> to vector<2x128xf32>
    %43 = arith.addf %40, %42 : vector<2x128xf32>
    %c0_36 = arith.constant 0 : index
    %c0_37 = arith.constant 0 : index
    %44 = vector.load %arg7[%c0_36, %c0_37] : memref<2x128xf32, #tpu.memory_space<vmem>>, vector<2x128xf32>
    tpu.vector_store %arg7[%c0_36, %c0_37], %43 {strides = array<i32>} : memref<2x128xf32, #tpu.memory_space<vmem>>, vector<2x128xf32>,
    return
  }
}

</mosaic_0001>

<bundles_post_ra>
// kernel: rnn_encoder_apply.1
= control target key start
LH: loop header
LB: loop body
LE: loop exit
PB: predicated region body
PF: predicated region fallthrough
CT: control target
= control target key end

     0   :  { %14 = vsyncpa [#allocation3], 0  ;;  %s811_s0 = inlined_call_operand.hbm [shape: f32[2,16], index: 0, kind: input, shape index: {}]   ;;  %s812_s1 = inlined_call_operand.hbm [shape: f32[2,2,32], index: 1, kind: input, shape index: {}, may-alias: {1,8}]   ;;  %s813_s2 = inlined_call_operand.vmem [shape: bf16[16,32], index: 2, kind: input, shape index: {}]   ;;  %s814_s3 = inlined_call_operand.hbm [shape: bf16[3,32,32], index: 3, kind: input, shape index: {}]   ;;  %s815_s4 = inlined_call_operand.vmem [shape: f32[2,1,32], index: 4, kind: input, shape index: {}]   ;;  %s816_s5 = inlined_call_operand.hbm [shape: bf16[32,128], index: 5, kind: input, shape index: {}]   ;;  %s817_s6 = inlined_call_operand.vmem [shape: f32[1,128], index: 6, kind: input, shape index: {}]   ;;  %s818_s7 = inlined_call_operand.vmem [shape: f32[2,128], index: 7, kind: output, shape index: {0}]   ;;  %s819_s8 = inlined_call_operand.hbm [shape: f32[2,2,32], index: 8, kind: output, shape index: {1}, may-alias: {1,8}]  }
   0x1   :  { %15 = vsyncpa [#allocation6], 0 }
   0x2   :  { %16 = vsyncpa [#allocation9], 0 }
   0x3   :  { %17 = vsyncpa [#allocation4], 0  ;;  %s649_s27 = smov [#allocation5]   ;;  %s531_s9 = scalar_lea.hbm %s812_s1, 64 }
   0x4   :  { %s33_s28 = sshll.u32 %s649_s27, 4  ;;  %p532_p0 = scmp.ne.s32.totalorder %s812_s1, %s531_s9  ;;  %s34_s28 = int_to_ptr.vmem [resolvable:$true] %s33_s28 }
   0x5   :  { %p535_p1 = scmp.lt.u32.totalorder %s531_s9, %s812_s1 }
   0x7   :  { %p537_p2 = pnand %p535_p1, %p532_p0 }
   0x9   :  { %540 = shalt.err (!%p537_p2)
}
   0xa   :  { %s541_s14 = scalar_lea.vmem %s34_s28, 64  ;;  %p546_p4 = scmp.lt.s32.totalorder %s34_s28, %s34_s28 }
   0xb   :  { %p542_p3 = scmp.ne.s32.totalorder %s34_s28, %s541_s14  ;;  %p547_p5 = scmp.lt.s32.totalorder %s541_s14, %s541_s14 }
   0xd   :  { %p548_p6 = por %p547_p5, %p546_p4 }
   0xf   :  { %p549_p7 = pnand %p548_p6, %p542_p3 }
  0x11   :  { %552 = shalt.err (!%p549_p7)
}
  0x12   :  { %s650_s15 = smov 32   ;;  %s651_s16 = smov 2  }
  0x13   :  { %39 = dma.hbm_to_vmem [thread:$0]  %s812_s1, 64, %s34_s28, [#allocation6], %s650_s15, %s650_s15, %s651_s16  }
  0x14   :  { %s652_s19 = smov [#allocation2]   ;;  %s653_s21 = smov [#allocation7]  }
  0x15   :  { %s24_s20 = sshll.u32 %s652_s19, 4  ;;  %s47_s22 = sshll.u32 %s653_s21, 4  ;;  %s25_s20 = int_to_ptr.vmem [resolvable:$true] %s24_s20  ;;  %s48_s22 = int_to_ptr.vmem [resolvable:$true] %s47_s22 }
  0x16   :  { %s553_s25 = scalar_lea.hbm %s811_s0, 32 }
  0x17   :  { %p554_p8 = scmp.ne.s32.totalorder %s811_s0, %s553_s25  ;;  %p557_p9 = scmp.lt.u32.totalorder %s553_s25, %s811_s0 }
  0x19   :  { %p559_p10 = pnand %p557_p9, %p554_p8 }
  0x1b   :  { %562 = shalt.err (!%p559_p10)
}
  0x1c   :  { %s563_s1 = scalar_lea.vmem %s25_s20, 32  ;;  %p568_p12 = scmp.lt.s32.totalorder %s25_s20, %s25_s20 }
  0x1d   :  { %p564_p11 = scmp.ne.s32.totalorder %s25_s20, %s563_s1  ;;  %p569_p13 = scmp.lt.s32.totalorder %s563_s1, %s563_s1 }
  0x1f   :  { %p570_p0 = por %p569_p13, %p568_p12 }
  0x21   :  { %p571_p1 = pnand %p570_p0, %p564_p11 }
  0x23   :  { %574 = shalt.err (!%p571_p1)
}
  0x24   :  { %27 = dma.hbm_to_vmem [thread:$0]  %s811_s0, 32, %s25_s20, [#allocation3]  }
  0x25   :  { %s575_s12 = scalar_lea.hbm %s814_s3, 768 }
  0x26   :  { %p576_p2 = scmp.ne.s32.totalorder %s814_s3, %s575_s12  ;;  %p579_p3 = scmp.lt.u32.totalorder %s575_s12, %s814_s3 }
  0x28   :  { %p581_p4 = pnand %p579_p3, %p576_p2 }
  0x2a   :  { %584 = shalt.err (!%p581_p4)
}
  0x2b   :  { %s585_s19 = scalar_lea.vmem %s48_s22, 768  ;;  %p590_p6 = scmp.lt.s32.totalorder %s48_s22, %s48_s22 }
  0x2c   :  { %p586_p5 = scmp.ne.s32.totalorder %s48_s22, %s585_s19  ;;  %p591_p7 = scmp.lt.s32.totalorder %s585_s19, %s585_s19 }
  0x2e   :  { %p592_p8 = por %p591_p7, %p590_p6 }
  0x30   :  { %p593_p9 = pnand %p592_p8, %p586_p5 }
  0x32   :  { %596 = shalt.err (!%p593_p9)
}
  0x33   :  { %s654_s0 = smov 64   ;;  %s655_s20 = smov 4  }
  0x34   :  { %53 = dma.hbm_to_vmem [thread:$0]  %s814_s3, 768, %s48_s22, [#allocation6], %s654_s0, %s654_s0, %s655_s20  }
  0x35   :  { %s656_s24 = smov [#allocation8]   ;;  %s597_s29 = scalar_lea.hbm %s816_s5, 256 }
  0x36   :  { %s61_s25 = sshll.u32 %s656_s24, 4  ;;  %p598_p10 = scmp.ne.s32.totalorder %s816_s5, %s597_s29  ;;  %s62_s25 = int_to_ptr.vmem [resolvable:$true] %s61_s25 }
  0x37   :  { %p601_p11 = scmp.lt.u32.totalorder %s597_s29, %s816_s5 }
  0x39   :  { %p603_p12 = pnand %p601_p11, %p598_p10 }
  0x3b   :  { %606 = shalt.err (!%p603_p12)
}
  0x3c   :  { %s607_s10 = scalar_lea.vmem %s62_s25, 256  ;;  %p612_p0 = scmp.lt.s32.totalorder %s62_s25, %s62_s25 }
  0x3d   :  { %p608_p13 = scmp.ne.s32.totalorder %s62_s25, %s607_s10  ;;  %p613_p1 = scmp.lt.s32.totalorder %s607_s10, %s607_s10 }
  0x3f   :  { %p614_p2 = por %p613_p1, %p612_p0 }
  0x41   :  { %p615_p3 = pnand %p614_p2, %p608_p13 }
  0x43   :  { %618 = shalt.err (!%p615_p3)
}
  0x44   :  { %67 = dma.hbm_to_vmem [thread:$0]  %s816_s5, 256, %s62_s25, [#allocation9], %s654_s0, %s654_s0, %s655_s20  }
  0x45   :  { %641 = dma.done.wait [#allocation3], 32  }
  0x46   :  { %642 = vsyncadd [#allocation3], 4294967264 }
  0x47   :  { %643 = dma.done.wait [#allocation6], 832  }
  0x48   :  { %644 = vsyncadd [#allocation6], 4294966464 }
  0x49   :  { %645 = dma.done.wait [#allocation9], 256  }
  0x4a   :  { %646 = vsyncadd [#allocation9], 4294967040  ;;  %v657_v0 = vmov 0.0   ;;  %vm658_vm0 = vmmov 0   ;;  %v518_v1 = vld [vmem:[#allocation7] sm:$0xff]   ;;  %v519_v2 = vld [vmem:[%s813_s2] sm:$0xff]  }
  0x4b   :  { %469 = vmatprep.subr.bf16.mxu0 %v657_v0  ;;  %477 = vmatprep.subr.bf16.mxu1 %v657_v0  ;;  %vm155_vm1 = vcmask 130048   ;;  %v520_v3 = vld [vmem:[#allocation7 + $0x8] sm:$0xff]   ;;  %vm105_vm2 = vcmask 261120   ;;  %v83_v4 = vld [vmem:[#allocation2] sm:$0x3]  ;;  %v521_v8 = vld [vmem:[#allocation7 + $0x10] sm:$0xff]  }
  0x4c   :  { %479 = vmatprep.mubr.msk.bf16.mxu1 %vm658_vm0, %v657_v0  ;;  %473 = vmatprep.mubr.msk.bf16.mxu0 %vm658_vm0, %v657_v0  ;;  %v87_v5 = vld [vmem:[#allocation5] sm:$0x3]  ;;  %v84_v6 = vpack.c.bf16 %v83_v4, %v83_v4  ;;  %v522_v9 = vld [vmem:[#allocation7 + $0x20] sm:$0xff]   ;;  %v524_v11 = vld [vmem:[#allocation7 + $0x28] sm:$0xff]   ;;  %vm208_vm3 = vcmask 254976   ;;  %s659_s17 = smov [#allocation10]  }
  0x4d   :  { %470 = vmatpush3.bf16.msra.mxu0 %v518_v1  ;;  %478 = vmatpush3.bf16.msra.mxu1 %v519_v2  ;;  %v88_v7 = vpack.c.bf16 %v87_v5, %v87_v5  ;;  %v523_v10 = vld [vmem:[#allocation7 + $0x18] sm:$0xff]   ;;  %v442_v18 = vld [vmem:[%s815_s4] ss:$0 sm:$0xff]  ;;  %v450_v34 = vld [vmem:[%s815_s4 + $0x1] ss:$0 sm:$0xff]  ;;  %s421_s18 = sshll.u32 %s659_s17, 4  ;;  %s422_s18 = int_to_ptr.vmem [resolvable:$true] %s421_s18 }
  0x4e   :  { %471 = vmatprep.subr.bf16.mxu0 %v657_v0  ;;  %483 = vmatprep.subr.bf16.mxu1 %v657_v0  ;;  %v217_v12 = vld [vmem:[#allocation5 + $0x2] sm:$0x3]  ;;  %v525_v31 = vld [vmem:[#allocation8] sm:$0xff]   ;;  %s619_s19 = scalar_lea.vmem %s422_s18, 64  ;;  %p624_p5 = scmp.lt.s32.totalorder %s422_s18, %s422_s18 }
  0x4f   :  { %v218_v13 = vpack.c.bf16 %v217_v12, %v217_v12  ;;  %v526_v32 = vld [vmem:[#allocation8 + $0x8] sm:$0xff]   ;;  %p620_p4 = scmp.ne.s32.totalorder %s422_s18, %s619_s19  ;;  %p625_p6 = scmp.lt.s32.totalorder %s619_s19, %s619_s19 }
  0x50   :  { %480 = vmatmul.mubr.msk.bf16.vlgmr.msra.gmra.mrb[0].mxu1 %vm155_vm1, %v84_v6 }
  0x51   :  { %472 = vmatpush3.bf16.msra.mxu0 %v520_v3  ;;  %487 = vmatprep.mubr.msk.bf16.mxu1 %vm658_vm0, %v657_v0  ;;  %p626_p7 = por %p625_p6, %p624_p5 }
  0x52   :  { %491 = vmatprep.subr.bf16.mxu0 %v657_v0  ;;  %484 = vmatpush3.bf16.msra.mxu1 %v521_v8 }
  0x53   :  { %485 = vmatprep.subr.bf16.mxu1 %v657_v0  ;;  %p627_p8 = pnand %p626_p7, %p620_p4 }
  0x54   :  { %474 = vmatmul.mubr.msk.bf16.vlgmr.msra.gmra.mrb[0].mxu0 %vm105_vm2, %v88_v7 }
  0x55   :  { %495 = vmatprep.mubr.msk.bf16.mxu0 %vm658_vm0, %v657_v0  ;;  %492 = vmatpush3.bf16.msra.mxu0 %v522_v9 }
  0x56   :  { %493 = vmatprep.subr.bf16.mxu0 %v657_v0  ;;  %486 = vmatpush3.bf16.msra.mxu1 %v523_v10 }
  0x57   :  { %499 = vmatprep.subr.bf16.mxu1 %v657_v0 }
  0x59   :  { %494 = vmatpush3.bf16.msra.mxu0 %v524_v11  ;;  %488 = vmatmul.mubr.msk.bf16.vlgmr.msra.gmra.mrb[4].mxu1 %vm105_vm2, %v218_v13 }
  0x5a   :  { %503 = vmatprep.mubr.msk.bf16.mxu1 %vm658_vm0, %v657_v0  ;;  %500 = vmatpush3.bf16.msra.mxu1 %v525_v31 }
  0x5b   :  { %501 = vmatprep.subr.bf16.mxu1 %v657_v0 }
  0x5e   :  { %502 = vmatpush3.bf16.msra.mxu1 %v526_v32 }
 0x123   :  { %v193_v14 = vpop.f32.mrb[0].mxu1 }
 0x124   :  { %v481_v15 = vpop.f32.mrb[1].mxu1 }
 0x125   :  { %v196_v16 = vpop.f32.mrb[2].mxu1 }
 0x126   :  { %v482_v19 = vpop.f32.mrb[3].mxu1 }
 0x127   :  { %v143_v17 = vpop.f32.mrb[0].mxu0 }
 0x128   :  { %v194_v20 = vadd.f32 %v193_v14, %v143_v17  ;;  %v475_v21 = vpop.f32.mrb[1].mxu0 }
 0x129   :  { %v146_v22 = vpop.f32.mrb[2].mxu0 }
 0x12a   :  { %v206_v23 = vadd.f32 %v442_v18, %v194_v20  ;;  %v476_v24 = vpop.f32.mrb[3].mxu0 }
 0x12c   :  { %527 = vtanh.f32 %v206_v23  ;;  %v273_v27 = vpop.f32.mrb[4].mxu1 }
 0x12d   :  { %v489_v28 = vpop.f32.mrb[5].mxu1 }
 0x12e   :  { %v276_v29 = vpop.f32.mrb[6].mxu1 }
 0x12f   :  { %v490_v30 = vpop.f32.mrb[7].mxu1 }
 0x136   :  { %v528_v25 = vpop.eup %527 }
 0x137   :  { %v210_v26 = vpack.c.bf16 %v528_v25, %v528_v25  ;;  %209 = vst.msk [vmem:[#allocation10] sm:$0x3] %vm208_vm3, %v528_v25 }
 0x139   :  { %496 = vmatmul.mubr.msk.bf16.vlgmr.msra.gmra.mrb[4].mxu0 %vm105_vm2, %v210_v26 }
 0x20c   :  { %v328_v33 = vpop.f32.mrb[4].mxu0 }
 0x20d   :  { %v329_v35 = vadd.f32 %v328_v33, %v273_v27  ;;  %v497_v36 = vpop.f32.mrb[5].mxu0 }
 0x20e   :  { %v331_v37 = vpop.f32.mrb[6].mxu0 }
 0x20f   :  { %v342_v38 = vadd.f32 %v450_v34, %v329_v35  ;;  %v498_v39 = vpop.f32.mrb[7].mxu0 }
 0x211   :  { %529 = vtanh.f32 %v342_v38 }
 0x21b   :  { %v530_v40 = vpop.eup %529 }
 0x21c   :  { %v346_v41 = vpack.c.bf16 %v530_v40, %v530_v40  ;;  %345 = vst.msk [vmem:[#allocation10 + $0x2] sm:$0x3] %vm208_vm3, %v530_v40 }
 0x21e   :  { %504 = vmatmul.mubr.msk.bf16.vlgmr.msra.gmra.mrb[8].mxu1 %vm105_vm2, %v346_v41 }
 0x21f   :  { %630 = shalt.err (!%p627_p8)
}
 0x220   :  { %s631_s20 = scalar_lea.hbm %s819_s8, 64 }
 0x221   :  { %p632_p9 = scmp.ne.s32.totalorder %s819_s8, %s631_s20  ;;  %p635_p10 = scmp.lt.u32.totalorder %s631_s20, %s819_s8 }
 0x223   :  { %p637_p11 = pnand %p635_p10, %p632_p9 }
 0x225   :  { %640 = shalt.err (!%p637_p11)
}
 0x226   :  { %427 = dma.vmem_to_hbm [thread:$0]  %s422_s18, 64, %s819_s8, [#allocation4], %s650_s15, %s650_s15, %s651_s16  }
 0x227   :  { %v451_v42 = vld [vmem:[%s817_s6] ss:$0 sm:$0xff] }
 0x2f1   :  { %v407_v43 = vpop.f32.mrb[8].mxu1 }
 0x2f2   :  { %v408_v44 = vadd.f32 %v451_v42, %v407_v43  ;;  %v505_v45 = vpop.f32.mrb[9].mxu1 }
 0x2f3   :  { %v410_v46 = vpop.f32.mrb[10].mxu1 }
 0x2f4   :  { %413 = vst [vmem:[%s818_s7] sm:$0x3] %v408_v44  ;;  %v506_v47 = vpop.f32.mrb[11].mxu1 }
 0x2f5   :  { %647 = dma.done.wait [#allocation4], 64  }
 0x2f6   :  { %648 = vsyncadd [#allocation4], 4294967232 }
 0x2f7   :  { %433 = vsyncpa [#allocation3], 1 }
 0x2f8   :  { %434 = vsyncpa [#allocation6], 1 }
 0x2f9   :  { %435 = vsyncpa [#allocation9], 1 }
 0x2fa   :  { %436 = vsyncpa [#allocation4], 1 }

</bundles_post_ra>
